<compile_context>
chip_gen: v7x
topology: tpu7x:2x2x1
jax: 0.10.0
libtpu: 0.0.40
codegen_flags: <defaults>
</compile_context>

<pallas_src>
import functools
import math

import jax
import jax.numpy as jnp
from jax.experimental import pallas as pl
from jax.experimental.pallas import tpu as pltpu

_LOG_2PI = math.log(2.0 * math.pi)


def _round_up(a, b):
    return -(-a // b) * b


def _sketch_loss_kernel(mix_ref, side_ref, out_ref, *, n_total, tn):
    # mix_ref : (6, M, TN)   side_ref: (9, TN) = [pen(3), dx, dy, p1, p2, p3, mask]
    # out_ref : (1, 8, 128)  per-block partial sum (value splatted across tile)
    f32 = jnp.float32

    pi_logit = mix_ref[0].astype(f32)            # (M, TN)
    mux = mix_ref[1].astype(f32)
    muy = mix_ref[2].astype(f32)
    log_sx = mix_ref[3].astype(f32)              # raw logit == log(sigma_x)
    log_sy = mix_ref[4].astype(f32)
    rho = jnp.tanh(mix_ref[5].astype(f32))

    side = side_ref[...].astype(f32)             # (9, TN)
    pen = side[0:3, :]                           # (3, TN)
    dx = side[3:4, :]                            # (1, TN) -> bcast over M
    dy = side[4:5, :]
    p = side[5:8, :]                             # (3, TN)
    mask = side[8:9, :]                          # (1, TN)

    # mixture-weight softmax over M (sublane axis)
    pi_shift = pi_logit - jnp.max(pi_logit, axis=0, keepdims=True)
    pi_e = jnp.exp(pi_shift)
    pi_w = pi_e / jnp.sum(pi_e, axis=0, keepdims=True)            # (M, TN)

    # Bivariate normal in log space:
    #   exp(log_v) == exp(-z/2) / (2*pi*sx*sy*sqrt(1 - rho^2 + 1e-8))
    inv_sx = jnp.exp(-log_sx)
    inv_sy = jnp.exp(-log_sy)
    dxn = (dx - mux) * inv_sx
    dyn = (dy - muy) * inv_sy
    one_m_rho2 = 1.0 - rho * rho + 1e-8
    z = (dxn * dxn + dyn * dyn - 2.0 * rho * dxn * dyn) / one_m_rho2
    log_v = -0.5 * (z + jnp.log(one_m_rho2)) - (log_sx + log_sy + _LOG_2PI)

    gmm = jnp.sum(pi_w * jnp.exp(log_v), axis=0, keepdims=True)   # (1, TN)
    ls = jnp.log(gmm + 1e-8)                                      # (1, TN)

    # Pen cross-entropy: q = softmax(pen), term = sum_k p_k * log(q_k + 1e-8)
    pen_shift = pen - jnp.max(pen, axis=0, keepdims=True)
    pen_e = jnp.exp(pen_shift)
    q = pen_e / jnp.sum(pen_e, axis=0, keepdims=True)
    lp = jnp.sum(p * jnp.log(q + 1e-8), axis=0, keepdims=True)    # (1, TN)

    # Apply the mask once; iota-based validity guards the ragged (unpadded)
    # tail of the last block (garbage lanes are deselected, never multiplied).
    lane = jax.lax.broadcasted_iota(jnp.int32, (1, tn), 1)
    valid = (pl.program_id(0) * tn + lane) < n_total
    keep = jnp.logical_and(valid, mask != 0.0)
    terms = jnp.where(keep, ls + lp, 0.0)                         # (1, TN)

    partial = jnp.sum(terms)
    out_ref[...] = jnp.broadcast_to(jnp.reshape(partial, (1, 1, 1)),
                                    out_ref.shape)


def sketch_rnn_loss(y, x, mu, sig_hat, R, eta_min, wkl, lengths, step,
                    Nmax, M, Nz, kl_min=0.01, block_n=8192,
                    low_precision_inputs=False):
    """JAX/Pallas equivalent of SKETCH_RNN_LOSS.forward.

    y: (S, B, 6*M + 3) raw decoder logits (S = Nmax + 1)
    x: (S - 1, B, 5)   ground-truth strokes (EOS row appended here)
    mu, sig_hat: (B, Nz)
    lengths: (B,) int sequence lengths
    Returns (total_loss, lr, lkl), matching the PyTorch module.
    """
    S, B, F = y.shape
    assert F == 6 * M + 3
    N = S * B

    # --- glue: EOS row, mask, lane-dense re-layout ------------------------
    # mix[p, m, s*B + b] = y[s, b, 6*m + p]  ->  lane-dense (6, M, N)
    mix_dtype = jnp.bfloat16 if low_precision_inputs else jnp.float32
    mix = jnp.transpose(y[:, :, :6 * M].astype(mix_dtype).reshape(S, B, M, 6),
                        (3, 2, 0, 1)).reshape(6, M, N)

    eos = jnp.broadcast_to(
        jnp.array([0.0, 0.0, 0.0, 0.0, 1.0], jnp.float32), (1, B, 5))
    x_full = jnp.concatenate([x.astype(jnp.float32), eos], axis=0)   # (S,B,5)
    mask = (jnp.arange(S)[:, None]
            < jnp.asarray(lengths)[None, :]).astype(jnp.float32)     # (S, B)

    pen = jnp.transpose(y[:, :, 6 * M:].astype(jnp.float32),
                        (2, 0, 1)).reshape(3, N)                     # (3, N)
    xt = jnp.transpose(x_full, (2, 0, 1)).reshape(5, N)              # (5, N)
    side = jnp.concatenate([pen, xt, mask.reshape(1, N)], axis=0)    # (9, N)

    # --- lane tiling (no HBM padding pass; ragged tail masked in-kernel) ---
    n128 = _round_up(N, 128)
    tn = min(_round_up(block_n, 128), n128)
    if n128 >= 256:
        # keep at least 2 grid blocks so both v7x TensorCores get work
        tn = min(tn, _round_up(-(-n128 // 2), 128))
    grid_n = pl.cdiv(N, tn)

    kernel = functools.partial(_sketch_loss_kernel, n_total=N, tn=tn)

    # --- hot path: Pallas kernel over a parallel 1-D grid -----------------
    partials = pl.pallas_call(
        kernel,
        out_shape=jax.ShapeDtypeStruct((grid_n, 8, 128), jnp.float32),
        grid_spec=pltpu.PrefetchScalarGridSpec(
            num_scalar_prefetch=0,
            grid=(grid_n,),
            in_specs=[
                pl.BlockSpec((6, M, tn), lambda i: (0, 0, i)),
                pl.BlockSpec((9, tn), lambda i: (0, i)),
            ],
            out_specs=pl.BlockSpec((1, 8, 128), lambda i: (i, 0, 0)),
        ),
        compiler_params=pltpu.CompilerParams(
            dimension_semantics=("parallel",),
            vmem_limit_bytes=32 * 1024 * 1024,
            # let XLA fuse the lane-dense relayout of the big mix operand into
            # the pallas input instead of materializing it in HBM
            allow_input_fusion=[True, False],
        ),
    )(mix, side)

    ll_sum = jnp.sum(partials[:, 0, 0])          # masked log-lik + pen log-lik

    # --- scalar epilogue (KL term + annealing) in plain JAX ----------------
    lr = -ll_sum / (float(B) * float(Nmax))
    sig = sig_hat.astype(jnp.float32)
    muf = mu.astype(jnp.float32)
    lkl = -jnp.sum(1.0 + sig - muf * muf - jnp.exp(sig)) / (
        float(B) * 2.0 * float(Nz))
    eta_step = 1.0 - (1.0 - eta_min) * (R ** step)
    kl_loss = jnp.maximum(lkl, jnp.float32(kl_min))
    total_loss = lr + wkl * eta_step * kl_loss
    return total_loss, lr, lkl


def _sketch_rnn_loss_ref(y, x, mu, sig_hat, R, eta_min, wkl, lengths, step,
                         Nmax, M, Nz, kl_min=0.01):
    """Pure-JAX mirror of the PyTorch reference (for correctness checking)."""
    y = y.astype(jnp.float32)
    S, B, _ = y.shape
    eos = jnp.broadcast_to(
        jnp.array([0.0, 0.0, 0.0, 0.0, 1.0], jnp.float32), (1, B, 5))
    xf = jnp.concatenate([x.astype(jnp.float32), eos], axis=0)        # (S,B,5)
    mask = (jnp.arange(S)[:, None]
            < jnp.asarray(lengths)[None, :]).astype(jnp.float32)      # (S,B)

    mixture = y[:, :, :6 * M].reshape(S, B, M, 6)
    pi = jax.nn.softmax(mixture[..., 0], axis=2)
    mux, muy = mixture[..., 1], mixture[..., 2]
    sx, sy = jnp.exp(mixture[..., 3]), jnp.exp(mixture[..., 4])
    rho = jnp.tanh(mixture[..., 5])
    q = jax.nn.softmax(y[:, :, 6 * M:], axis=2)

    dx = xf[..., 0][..., None]
    dy = xf[..., 1][..., None]
    dxn = (dx - mux) / sx
    dyn = (dy - muy) / sy
    z = (dxn ** 2 + dyn ** 2 - 2.0 * rho * dxn * dyn) / (1.0 - rho ** 2 + 1e-8)
    denom = 2.0 * math.pi * sx * sy * jnp.sqrt(1.0 - rho ** 2 + 1e-8)
    v = jnp.exp(-z / 2.0) / denom
    ls = jnp.log(jnp.sum(pi * v, axis=-1) + 1e-8) * mask
    lp = jnp.sum(xf[..., 2:5] * jnp.log(q + 1e-8), axis=-1) * mask

    lr = -(jnp.sum(ls) + jnp.sum(lp)) / (float(B) * float(Nmax))
    lkl = -jnp.sum(1.0 + sig_hat - mu ** 2 - jnp.exp(sig_hat)) / (
        float(B) * 2.0 * float(Nz))
    eta_step = 1.0 - (1.0 - eta_min) * (R ** step)
    total = lr + wkl * eta_step * jnp.maximum(lkl, jnp.float32(kl_min))
    return total, lr, lkl


if __name__ == "__main__":
    Nmax, M, Nz, B = 8, 4, 16, 2
    S = Nmax + 1                      # decoder emits Nmax+1 steps (incl. EOS)

    key = jax.random.PRNGKey(0)
    k1, k2, k3, k4 = jax.random.split(key, 4)
    y = jax.random.normal(k1, (S, B, 6 * M + 3), jnp.float32)
    x = jax.random.normal(k2, (Nmax, B, 5), jnp.float32)
    mu = jax.random.normal(k3, (B, Nz), jnp.float32)
    sig_hat = jax.random.normal(k4, (B, Nz), jnp.float32)
    lengths = jnp.array([6, 8], jnp.int32)

    R, eta_min, wkl, step = 0.99995, 0.01, 0.5, 100

    total, lr, lkl = sketch_rnn_loss(
        y, x, mu, sig_hat, R, eta_min, wkl, lengths, step, Nmax, M, Nz)
    jax.block_until_ready((total, lr, lkl))

    t_ref, lr_ref, lkl_ref = _sketch_rnn_loss_ref(
        y, x, mu, sig_hat, R, eta_min, wkl, lengths, step, Nmax, M, Nz)
    jax.block_until_ready((t_ref, lr_ref, lkl_ref))

    got = jnp.stack([total, lr, lkl])
    want = jnp.stack([t_ref, lr_ref, lkl_ref])
    if bool(jnp.allclose(got, want, rtol=1e-3, atol=1e-4)):
        print("KERNEL_OK")
    else:
        print("MISMATCH", got, want)
</pallas_src>

<mosaic_0001>
module attributes {stable_mosaic.version = 11 : i64} {
  func.func @_sketch_loss_kernel(%arg0: i32, %arg1: memref<6x4x128xf32, #tpu.memory_space<vmem>>, %arg2: memref<9x128xf32, #tpu.memory_space<vmem>>, %arg3: memref<1x8x128xf32, #tpu.memory_space<vmem>>) attributes {dimension_semantics = [#tpu.dimension_semantics<parallel>], iteration_bounds = array<i64: 1>, scalar_prefetch = 0 : i64, scratch_operands = 0 : i64, tpu.core_type = #tpu.core_type<tc>, window_params = [{transform_indices = @transform_0, window_bounds = array<i64: 6, 4, 128>}, {transform_indices = @transform_1, window_bounds = array<i64: 9, 128>}, {transform_indices = @transform_2, window_bounds = array<i64: 1, 8, 128>}]} {
    %c0 = arith.constant 0 : index
    %c0_0 = arith.constant 0 : index
    %c0_1 = arith.constant 0 : index
    %0 = vector.load %arg1[%c0, %c0_0, %c0_1] : memref<6x4x128xf32, #tpu.memory_space<vmem>>, vector<1x4x128xf32>
    %1 = vector.shape_cast %0 : vector<1x4x128xf32> to vector<4x128xf32>
    %c1 = arith.constant 1 : index
    %c0_2 = arith.constant 0 : index
    %c0_3 = arith.constant 0 : index
    %2 = vector.load %arg1[%c1, %c0_2, %c0_3] : memref<6x4x128xf32, #tpu.memory_space<vmem>>, vector<1x4x128xf32>
    %3 = vector.shape_cast %2 : vector<1x4x128xf32> to vector<4x128xf32>
    %c2 = arith.constant 2 : index
    %c0_4 = arith.constant 0 : index
    %c0_5 = arith.constant 0 : index
    %4 = vector.load %arg1[%c2, %c0_4, %c0_5] : memref<6x4x128xf32, #tpu.memory_space<vmem>>, vector<1x4x128xf32>
    %5 = vector.shape_cast %4 : vector<1x4x128xf32> to vector<4x128xf32>
    %c3 = arith.constant 3 : index
    %c0_6 = arith.constant 0 : index
    %c0_7 = arith.constant 0 : index
    %6 = vector.load %arg1[%c3, %c0_6, %c0_7] : memref<6x4x128xf32, #tpu.memory_space<vmem>>, vector<1x4x128xf32>
    %7 = vector.shape_cast %6 : vector<1x4x128xf32> to vector<4x128xf32>
    %c4 = arith.constant 4 : index
    %c0_8 = arith.constant 0 : index
    %c0_9 = arith.constant 0 : index
    %8 = vector.load %arg1[%c4, %c0_8, %c0_9] : memref<6x4x128xf32, #tpu.memory_space<vmem>>, vector<1x4x128xf32>
    %9 = vector.shape_cast %8 : vector<1x4x128xf32> to vector<4x128xf32>
    %c5 = arith.constant 5 : index
    %c0_10 = arith.constant 0 : index
    %c0_11 = arith.constant 0 : index
    %10 = vector.load %arg1[%c5, %c0_10, %c0_11] : memref<6x4x128xf32, #tpu.memory_space<vmem>>, vector<1x4x128xf32>
    %11 = vector.shape_cast %10 : vector<1x4x128xf32> to vector<4x128xf32>
    %12 = math.tanh %11 : vector<4x128xf32>
    %c0_12 = arith.constant 0 : index
    %c0_13 = arith.constant 0 : index
    %13 = vector.load %arg2[%c0_12, %c0_13] : memref<9x128xf32, #tpu.memory_space<vmem>>, vector<9x128xf32>
    %14 = vector.extract_strided_slice %13 {offsets = [0, 0], sizes = [3, 128], strides = [1, 1]} : vector<9x128xf32> to vector<3x128xf32>
    %15 = vector.extract_strided_slice %13 {offsets = [3, 0], sizes = [1, 128], strides = [1, 1]} : vector<9x128xf32> to vector<1x128xf32>
    %16 = vector.extract_strided_slice %13 {offsets = [4, 0], sizes = [1, 128], strides = [1, 1]} : vector<9x128xf32> to vector<1x128xf32>
    %17 = vector.extract_strided_slice %13 {offsets = [5, 0], sizes = [3, 128], strides = [1, 1]} : vector<9x128xf32> to vector<3x128xf32>
    %18 = vector.extract_strided_slice %13 {offsets = [8, 0], sizes = [1, 128], strides = [1, 1]} : vector<9x128xf32> to vector<1x128xf32>
    %cst = arith.constant dense<0xFF800000> : vector<128xf32>
    %19 = vector.multi_reduction <maximumf>, %1, %cst [0] : vector<4x128xf32> to vector<128xf32>
    %20 = vector.shape_cast %19 : vector<128xf32> to vector<1x128xf32>
    %21 = vector.broadcast %20 : vector<1x128xf32> to vector<4x128xf32>
    %22 = arith.subf %1, %21 : vector<4x128xf32>
    %23 = math.exp %22 : vector<4x128xf32>
    %cst_14 = arith.constant dense<0.000000e+00> : vector<128xf32>
    %24 = vector.multi_reduction <add>, %23, %cst_14 [0] : vector<4x128xf32> to vector<128xf32>
    %25 = vector.shape_cast %24 : vector<128xf32> to vector<1x128xf32>
    %26 = vector.broadcast %25 : vector<1x128xf32> to vector<4x128xf32>
    %27 = arith.divf %23, %26 : vector<4x128xf32>
    %cst_15 = arith.constant 0.000000e+00 : f32
    %28 = vector.broadcast %cst_15 : f32 to vector<4x128xf32>
    %29 = arith.subf %28, %7 : vector<4x128xf32>
    %30 = math.exp %29 : vector<4x128xf32>
    %cst_16 = arith.constant 0.000000e+00 : f32
    %31 = vector.broadcast %cst_16 : f32 to vector<4x128xf32>
    %32 = arith.subf %31, %9 : vector<4x128xf32>
    %33 = math.exp %32 : vector<4x128xf32>
    %34 = vector.broadcast %15 : vector<1x128xf32> to vector<4x128xf32>
    %35 = arith.subf %34, %3 : vector<4x128xf32>
    %36 = arith.mulf %35, %30 : vector<4x128xf32>
    %37 = vector.broadcast %16 : vector<1x128xf32> to vector<4x128xf32>
    %38 = arith.subf %37, %5 : vector<4x128xf32>
    %39 = arith.mulf %38, %33 : vector<4x128xf32>
    %40 = arith.mulf %12, %12 : vector<4x128xf32>
    %cst_17 = arith.constant 1.000000e+00 : f32
    %41 = vector.broadcast %cst_17 : f32 to vector<4x128xf32>
    %42 = arith.subf %41, %40 : vector<4x128xf32>
    %cst_18 = arith.constant 9.99999993E-9 : f32
    %43 = vector.broadcast %cst_18 : f32 to vector<4x128xf32>
    %44 = arith.addf %42, %43 : vector<4x128xf32>
    %45 = arith.mulf %36, %36 : vector<4x128xf32>
    %46 = arith.mulf %39, %39 : vector<4x128xf32>
    %47 = arith.addf %45, %46 : vector<4x128xf32>
    %cst_19 = arith.constant 2.000000e+00 : f32
    %48 = vector.broadcast %cst_19 : f32 to vector<4x128xf32>
    %49 = arith.mulf %48, %12 : vector<4x128xf32>
    %50 = arith.mulf %49, %36 : vector<4x128xf32>
    %51 = arith.mulf %50, %39 : vector<4x128xf32>
    %52 = arith.subf %47, %51 : vector<4x128xf32>
    %53 = arith.divf %52, %44 : vector<4x128xf32>
    %54 = math.log %44 : vector<4x128xf32>
    %55 = arith.addf %53, %54 : vector<4x128xf32>
    %cst_20 = arith.constant -5.000000e-01 : f32
    %56 = vector.broadcast %cst_20 : f32 to vector<4x128xf32>
    %57 = arith.mulf %56, %55 : vector<4x128xf32>
    %58 = arith.addf %7, %9 : vector<4x128xf32>
    %cst_21 = arith.constant 1.83787704 : f32
    %59 = vector.broadcast %cst_21 : f32 to vector<4x128xf32>
    %60 = arith.addf %58, %59 : vector<4x128xf32>
    %61 = arith.subf %57, %60 : vector<4x128xf32>
    %62 = math.exp %61 : vector<4x128xf32>
    %63 = arith.mulf %27, %62 : vector<4x128xf32>
    %cst_22 = arith.constant dense<0.000000e+00> : vector<128xf32>
    %64 = vector.multi_reduction <add>, %63, %cst_22 [0] : vector<4x128xf32> to vector<128xf32>
    %65 = vector.shape_cast %64 : vector<128xf32> to vector<1x128xf32>
    %cst_23 = arith.constant 9.99999993E-9 : f32
    %66 = vector.broadcast %cst_23 : f32 to vector<1x128xf32>
    %67 = arith.addf %65, %66 : vector<1x128xf32>
    %68 = math.log %67 : vector<1x128xf32>
    %cst_24 = arith.constant dense<0xFF800000> : vector<128xf32>
    %69 = vector.multi_reduction <maximumf>, %14, %cst_24 [0] : vector<3x128xf32> to vector<128xf32>
    %70 = vector.shape_cast %69 : vector<128xf32> to vector<1x128xf32>
    %71 = vector.broadcast %70 : vector<1x128xf32> to vector<3x128xf32>
    %72 = arith.subf %14, %71 : vector<3x128xf32>
    %73 = math.exp %72 : vector<3x128xf32>
    %cst_25 = arith.constant dense<0.000000e+00> : vector<128xf32>
    %74 = vector.multi_reduction <add>, %73, %cst_25 [0] : vector<3x128xf32> to vector<128xf32>
    %75 = vector.shape_cast %74 : vector<128xf32> to vector<1x128xf32>
    %76 = vector.broadcast %75 : vector<1x128xf32> to vector<3x128xf32>
    %77 = arith.divf %73, %76 : vector<3x128xf32>
    %cst_26 = arith.constant 9.99999993E-9 : f32
    %78 = vector.broadcast %cst_26 : f32 to vector<3x128xf32>
    %79 = arith.addf %77, %78 : vector<3x128xf32>
    %80 = math.log %79 : vector<3x128xf32>
    %81 = arith.mulf %17, %80 : vector<3x128xf32>
    %cst_27 = arith.constant dense<0.000000e+00> : vector<128xf32>
    %82 = vector.multi_reduction <add>, %81, %cst_27 [0] : vector<3x128xf32> to vector<128xf32>
    %83 = vector.shape_cast %82 : vector<128xf32> to vector<1x128xf32>
    %84 = tpu.iota {dimensions = array<i32: 1>} : vector<1x128xi32>
    %c128_i32 = arith.constant 128 : i32
    %85 = arith.muli %arg0, %c128_i32 : i32
    %86 = vector.broadcast %85 : i32 to vector<1x128xi32>
    %87 = arith.addi %86, %84 : vector<1x128xi32>
    %c18_i32 = arith.constant 18 : i32
    %88 = vector.broadcast %c18_i32 : i32 to vector<1x128xi32>
    %89 = arith.cmpi slt, %87, %88 : vector<1x128xi32>
    %cst_28 = arith.constant 0.000000e+00 : f32
    %90 = vector.broadcast %cst_28 : f32 to vector<1x128xf32>
    %91 = arith.cmpf one, %18, %90 : vector<1x128xf32>
    %92 = arith.andi %89, %91 : vector<1x128xi1>
    %93 = arith.addf %68, %83 : vector<1x128xf32>
    %cst_29 = arith.constant 0.000000e+00 : f32
    %94 = vector.broadcast %cst_29 : f32 to vector<1x128xf32>
    %95 = arith.select %92, %93, %94 : vector<1x128xi1>, vector<1x128xf32>
    %96 = vector.shape_cast %95 : vector<1x128xf32> to vector<1x1x128xf32>
    %cst_30 = arith.constant dense<0.000000e+00> : vector<1xf32>
    %97 = vector.multi_reduction <add>, %96, %cst_30 [1, 2] : vector<1x1x128xf32> to vector<1xf32>
    %98 = vector.shape_cast %97 : vector<1xf32> to vector<1x1x1xf32>
    %99 = vector.extract %98[0, 0, 0] : f32 from vector<1x1x1xf32>
    %100 = vector.broadcast %99 : f32 to vector<1x1x1xf32>
    %101 = vector.shape_cast %100 : vector<1x1x1xf32> to vector<1x1x1xf32>
    %102 = vector.broadcast %101 : vector<1x1x1xf32> to vector<1x8x128xf32>
    %c0_31 = arith.constant 0 : index
    %c0_32 = arith.constant 0 : index
    %c0_33 = arith.constant 0 : index
    %103 = vector.load %arg3[%c0_31, %c0_32, %c0_33] : memref<1x8x128xf32, #tpu.memory_space<vmem>>, vector<1x8x128xf32>
    tpu.vector_store %arg3[%c0_31, %c0_32, %c0_33], %102 {strides = array<i32>} : memref<1x8x128xf32, #tpu.memory_space<vmem>>, vector<1x8x128xf32>,
    return
  }
  func.func @transform_0(%arg0: i32) -> (i32, i32, i32) {
    %c0_i32 = arith.constant 0 : i32
    %c0_i32_0 = arith.constant 0 : i32
    %c0_i32_1 = arith.constant 0 : i32
    return %c0_i32, %c0_i32_0, %arg0 : i32, i32, i32
  }
  func.func @transform_1(%arg0: i32) -> (i32, i32) {
    %c0_i32 = arith.constant 0 : i32
    %c0_i32_0 = arith.constant 0 : i32
    return %c0_i32, %arg0 : i32, i32
  }
  func.func @transform_2(%arg0: i32) -> (i32, i32, i32) {
    %c0_i32 = arith.constant 0 : i32
    %c0_i32_0 = arith.constant 0 : i32
    %c0_i32_1 = arith.constant 0 : i32
    return %arg0, %c0_i32, %c0_i32_0 : i32, i32, i32
  }
}

</mosaic_0001>

<bundles_post_ra>
// kernel: tpu_custom_call.1
= control target key start
LH: loop header
LB: loop body
LE: loop exit
PB: predicated region body
PF: predicated region fallthrough
CT: control target
= control target key end

     0   :  { %7 = vsyncpa [#allocation3], 0  ;;  %s378_s0 = inlined_call_operand.hbm [shape: f32[6,4,18], index: 0, kind: input, shape index: {}]   ;;  %s379_s1 = inlined_call_operand.hbm [shape: f32[9,18], index: 1, kind: input, shape index: {}]   ;;  %s380_s2 = inlined_call_operand.hbm [shape: f32[1,8,128], index: 2, kind: output, shape index: {}]  }
   0x1   :  { %8 = vsyncpa [#allocation6], 0 }
   0x2   :  { %9 = vsyncpa [#allocation4], 0  ;;  %s305_s9 = smov [#allocation2]   ;;  %s233_s13 = scalar_lea.hbm %s378_s0, 384 }
   0x3   :  { %s15_s10 = sshll.u32 %s305_s9, 4  ;;  %p234_p0 = scmp.ne.s32.totalorder %s378_s0, %s233_s13  ;;  %s16_s10 = int_to_ptr.vmem [resolvable:$true] %s15_s10 }
   0x4   :  { %p237_p1 = scmp.lt.u32.totalorder %s233_s13, %s378_s0 }
   0x6   :  { %p239_p2 = pnand %p237_p1, %p234_p0 }
   0x8   :  { %242 = shalt.err (!%p239_p2)
}
   0x9   :  { %s243_s18 = scalar_lea.vmem %s16_s10, 384  ;;  %p248_p4 = scmp.lt.s32.totalorder %s16_s10, %s16_s10 }
   0xa   :  { %p244_p3 = scmp.ne.s32.totalorder %s16_s10, %s243_s18  ;;  %p249_p5 = scmp.lt.s32.totalorder %s243_s18, %s243_s18 }
   0xc   :  { %p250_p6 = por %p249_p5, %p248_p4 }
   0xe   :  { %p251_p7 = pnand %p250_p6, %p244_p3 }
  0x10   :  { %254 = shalt.err (!%p251_p7)
}
  0x11   :  { %s306_s19 = smov 64   ;;  %s307_s20 = smov 4  }
  0x12   :  { %21 = dma.hbm_to_vmem [thread:$0]  %s378_s0, 384, %s16_s10, [#allocation3], %s306_s19, %s306_s19, %s307_s20  }
  0x13   :  { %s308_s23 = smov [#allocation5]   ;;  %s255_s27 = scalar_lea.hbm %s379_s1, 256 }
  0x14   :  { %s27_s24 = sshll.u32 %s308_s23, 4  ;;  %p256_p8 = scmp.ne.s32.totalorder %s379_s1, %s255_s27  ;;  %s28_s24 = int_to_ptr.vmem [resolvable:$true] %s27_s24 }
  0x15   :  { %p259_p9 = scmp.lt.u32.totalorder %s255_s27, %s379_s1 }
  0x17   :  { %p261_p10 = pnand %p259_p9, %p256_p8 }
  0x19   :  { %264 = shalt.err (!%p261_p10)
}
  0x1a   :  { %s265_s4 = scalar_lea.vmem %s28_s24, 256  ;;  %p270_p12 = scmp.lt.s32.totalorder %s28_s24, %s28_s24 }
  0x1b   :  { %p266_p11 = scmp.ne.s32.totalorder %s28_s24, %s265_s4  ;;  %p271_p13 = scmp.lt.s32.totalorder %s265_s4, %s265_s4 }
  0x1d   :  { %p272_p0 = por %p271_p13, %p270_p12 }
  0x1f   :  { %p273_p1 = pnand %p272_p0, %p266_p11 }
  0x21   :  { %276 = shalt.err (!%p273_p1)
}
  0x22   :  { %s309_s0 = smov 128   ;;  %s310_s5 = smov 8  }
  0x23   :  { %33 = dma.hbm_to_vmem [thread:$0]  %s379_s1, 256, %s28_s24, [#allocation6], %s309_s0, %s309_s0, %s310_s5  }
  0x24   :  { %299 = dma.done.wait [#allocation3], 384  }
  0x25   :  { %300 = vsyncadd [#allocation3], 4294966912 }
  0x26   :  { %301 = dma.done.wait [#allocation6], 256  }
  0x27   :  { %302 = vsyncadd [#allocation6], 4294967040  ;;  %v80_v0 = vlaneseq  ;;  %vm54_vm0 = vcmask 1043456   ;;  %v40_v1 = vld [vmem:[#allocation2] sm:$0xf]  ;;  %vm124_vm1 = vcmask 1042432  }
  0x28   :  { %v46_v3 = vld [vmem:[#allocation2 + $0xc] sm:$0xf]  ;;  %v48_v4 = vld [vmem:[#allocation2 + $0x10] sm:$0xf]  ;;  %v50_v5 = vld [vmem:[#allocation2 + $0x14] sm:$0xf] }
  0x29   :  { %v81_v2 = vshrl.u32 %v80_v0, 7  ;;  %209 = vtanh.f32 %v50_v5  ;;  %v352_v6 = vld [vmem:[#allocation5] sm:$0xff]  ;;  %v55_v7 = vsel %vm54_vm0, %v40_v1, -inf  ;;  %v74_v8 = vsub.f32 0.0, %v46_v3  ;;  %v42_v22 = vld [vmem:[#allocation2 + $0x4] sm:$0xf] }
  0x2a   :  { %v77_v9 = vsub.f32 0.0, %v48_v4  ;;  %v56_v10 = vrot.slane %v55_v7, 4  ;;  %v125_v13 = vsel %vm124_vm1, %v352_v6, -inf  ;;  %v44_v25 = vld [vmem:[#allocation2 + $0x8] sm:$0xf]  ;;  %v108_v55 = vadd.f32 %v48_v4, %v46_v3  ;;  %s311_s1 = smov [#allocation7]  }
  0x2b   :  { %v75_v11 = vmul.f32 1.442695, %v74_v8  ;;  %v82_v15 = vsub.s32 3, %v81_v2  ;;  %v88_v16 = vsub.s32 4, %v81_v2  ;;  %v126_v17 = vrot.slane %v125_v13, 4  ;;  %s190_s8 = sshll.u32 %s311_s1, 4  ;;  %s191_s8 = int_to_ptr.vmem [resolvable:$true] %s190_s8 }
  0x2c   :  { %v78_v12 = vmul.f32 1.442695, %v77_v9  ;;  %v57_v14 = vmax.f32 %v55_v7, %v56_v10  ;;  %vm171_vm5 = vcmask 1040384   ;;  %s277_s10 = scalar_lea.vmem %s191_s8, 128  ;;  %p282_p3 = scmp.lt.s32.totalorder %s191_s8, %s191_s8 }
  0x2d   :  { %211 = vpow2.f32 %v75_v11  ;;  %v127_v19 = vmax.f32 %v125_v13, %v126_v17  ;;  %v83_v21 = vrot.slane %v352_v6, %v82_v15  ;;  %v89_v23 = vrot.slane %v352_v6, %v88_v16  ;;  %p278_p2 = scmp.ne.s32.totalorder %s191_s8, %s277_s10  ;;  %p283_p4 = scmp.lt.s32.totalorder %s277_s10, %s277_s10 }
  0x2e   :  { %v58_v18 = vrot.slane %v57_v14, 2  ;;  %213 = vpow2.f32 %v78_v12 }
  0x2f   :  { %v128_v24 = vrot.slane %v127_v19, 2  ;;  %v84_v30 = vsub.f32 %v83_v21, %v42_v22  ;;  %v90_v32 = vsub.f32 %v89_v23, %v44_v25  ;;  %p284_p5 = por %p283_p4, %p282_p3 }
  0x30   :  { %v59_v20 = vmax.f32 %v57_v14, %v58_v18 }
  0x31   :  { %v129_v28 = vmax.f32 %v127_v19, %v128_v24  ;;  %p285_p6 = pnand %p284_p5, %p278_p2 }
  0x32   :  { %v60_v26 = vrot.slane %v59_v20, 1 }
  0x33   :  { %v210_v27 = vpop.eup %209  ;;  %v130_v33 = vrot.slane %v129_v28, 1 }
  0x34   :  { %v61_v29 = vmax.f32 %v59_v20, %v60_v26  ;;  %v92_v31 = vmul.f32 %v210_v27, %v210_v27  ;;  %v98_v36 = vmul.f32 2.0, %v210_v27 }
  0x35   :  { %v131_v38 = vmax.f32 %v129_v28, %v130_v33 }
  0x36   :  { %v62_v34 = vsub.f32 %v40_v1, %v61_v29  ;;  %v93_v35 = vsub.f32 1.0, %v92_v31  ;;  %v109_v1 = vadd.f32 1.837877, %v108_v55 }
  0x37   :  { %v212_v37 = vpop.eup %211  ;;  %v132_v44 = vsub.f32 %v352_v6, %v131_v38 }
  0x38   :  { %v214_v39 = vpop.eup %213  ;;  %v63_v40 = vmul.f32 1.442695, %v62_v34  ;;  %v85_v41 = vmul.f32 %v212_v37, %v84_v30  ;;  %v94_v42 = vadd.f32 1e-08, %v93_v35 }
  0x39   :  { %v91_v43 = vmul.f32 %v214_v39, %v90_v32  ;;  %v133_v48 = vmul.f32 1.442695, %v132_v44 }
  0x3a   :  { %215 = vpow2.f32 %v63_v40  ;;  %v95_v45 = vmul.f32 %v85_v41, %v85_v41  ;;  %v99_v46 = vmul.f32 %v98_v36, %v85_v41  ;;  %v162_v40 = vand.u32 127, %v80_v0 }
  0x3b   :  { %v96_v47 = vmul.f32 %v91_v43, %v91_v43  ;;  %217 = vrcp.f32 %v94_v42 }
  0x3c   :  { %219 = vlog2.f32 %v94_v42  ;;  %v100_v50 = vmul.f32 %v99_v46, %v91_v43  ;;  %v53_v42 = vld [vmem:[#allocation5 + $0x8] sm:$0x1]  ;;  %vm166_vm2 = vcmp.lt.s32.totalorder %v162_v40, 18 }
  0x3d   :  { %221 = vpow2.f32 %v133_v48  ;;  %v97_v49 = vadd.f32 %v96_v47, %v95_v45  ;;  %vm167_vm3 = vcmp.ne.f32.partialorder %v53_v42, 0.0 }
  0x3e   :  { %vm168_vm4 = vmand %vm166_vm2, %vm167_vm3 }
  0x3f   :  { %v101_v51 = vsub.f32 %v97_v49, %v100_v50 }
  0x44   :  { %v216_v52 = vpop.eup %215 }
  0x45   :  { %v218_v53 = vpop.eup %217  ;;  %v65_v54 = vsel %vm54_vm0, %v216_v52, 0.0 }
  0x46   :  { %v220_v56 = vpop.eup %219  ;;  %v66_v57 = vrot.slane %v65_v54, 4  ;;  %v103_v58 = vmul.f32 %v218_v53, %v101_v51 }
  0x47   :  { %v222_v59 = vpop.eup %221  ;;  %v105_v60 = vmul.f32 0.6931472, %v220_v56 }
  0x48   :  { %v67_v61 = vadd.f32 %v66_v57, %v65_v54  ;;  %v135_v62 = vsel %vm124_vm1, %v222_v59, 0.0 }
  0x49   :  { %v106_v63 = vadd.f32 %v105_v60, %v103_v58  ;;  %v136_v2 = vrot.slane %v135_v62, 4 }
  0x4a   :  { %v68_v5 = vrot.slane %v67_v61, 2 }
  0x4b   :  { %v107_v7 = vmul.f32 -0.5, %v106_v63  ;;  %v137_v8 = vadd.f32 %v136_v2, %v135_v62 }
  0x4c   :  { %v69_v9 = vadd.f32 %v68_v5, %v67_v61 }
  0x4d   :  { %v110_v10 = vsub.f32 %v107_v7, %v109_v1  ;;  %v138_v11 = vrot.slane %v137_v8, 2 }
  0x4e   :  { %v70_v12 = vrot.slane %v69_v9, 1 }
  0x4f   :  { %v111_v13 = vmul.f32 1.442695, %v110_v10  ;;  %v139_v3 = vadd.f32 %v138_v11, %v137_v8 }
  0x50   :  { %v71_v4 = vadd.f32 %v70_v12, %v69_v9 }
  0x51   :  { %223 = vpow2.f32 %v111_v13  ;;  %v140_v14 = vrot.slane %v139_v3, 1 }
  0x52   :  { %225 = vrcp.f32 %v71_v4 }
  0x53   :  { %v141_v15 = vadd.f32 %v140_v14, %v139_v3 }
  0x55   :  { %227 = vrcp.f32 %v141_v15 }
  0x5b   :  { %v224_v16 = vpop.eup %223 }
  0x5c   :  { %v226_v17 = vpop.eup %225 }
  0x5d   :  { %v73_v18 = vmul.f32 %v226_v17, %v216_v52 }
  0x5f   :  { %v228_v19 = vpop.eup %227  ;;  %v113_v20 = vmul.f32 %v224_v16, %v73_v18 }
  0x60   :  { %v143_v21 = vmul.f32 %v228_v19, %v222_v59 }
  0x61   :  { %v114_v22 = vsel %vm54_vm0, %v113_v20, 0.0 }
  0x62   :  { %v115_v23 = vrot.slane %v114_v22, 4  ;;  %v144_v24 = vadd.f32 1e-08, %v143_v21 }
  0x64   :  { %v116_v25 = vadd.f32 %v115_v23, %v114_v22  ;;  %229 = vlog2.f32 %v144_v24 }
  0x66   :  { %v117_v26 = vrot.slane %v116_v25, 2 }
  0x68   :  { %v118_v27 = vadd.f32 %v117_v26, %v116_v25 }
  0x6a   :  { %v119_v28 = vrot.slane %v118_v27, 1 }
  0x6c   :  { %v120_v29 = vadd.f32 %v119_v28, %v118_v27 }
  0x6e   :  { %v230_v30 = vpop.eup %229  ;;  %v121_v31 = vadd.f32 1e-08, %v120_v29 }
  0x6f   :  { %v146_v32 = vmul.f32 0.6931472, %v230_v30 }
  0x70   :  { %231 = vlog2.f32 %v121_v31 }
  0x71   :  { %v148_v33 = vrot.slane %v146_v32, 3 }
  0x73   :  { %v150_v34 = vmul.f32 %v148_v33, %v352_v6 }
  0x75   :  { %v152_v35 = vrot.slane %v150_v34, 5 }
  0x77   :  { %v154_v36 = vsel %vm124_vm1, %v152_v35, 0.0 }
  0x78   :  { %v155_v37 = vrot.slane %v154_v36, 4 }
  0x7a   :  { %v156_v38 = vadd.f32 %v155_v37, %v154_v36  ;;  %v232_v41 = vpop.eup %231 }
  0x7b   :  { %v123_v44 = vmul.f32 0.6931472, %v232_v41 }
  0x7c   :  { %v157_v39 = vrot.slane %v156_v38, 2 }
  0x7e   :  { %v158_v43 = vadd.f32 %v157_v39, %v156_v38 }
  0x80   :  { %v159_v45 = vrot.slane %v158_v43, 1 }
  0x82   :  { %v160_v46 = vadd.f32 %v159_v45, %v158_v43 }
  0x84   :  { %v169_v47 = vadd.f32 %v160_v46, %v123_v44 }
  0x86   :  { %v170_v6 = vsel %vm168_vm4, %v169_v47, 0.0 }
  0x87   :  { %v172_v48 = vsel %vm171_vm5, %v170_v6, 0.0 }
  0x88   :  { %173 = vadd.xlane.f32.xlu0 %v172_v48 }
 0x115   :  { %v174_v49 = vpop.xlane.xlu0 %173 }
 0x116   :  { %v175_v50 = vrot.slane %v174_v49, 4 }
 0x118   :  { %v176_v51 = vadd.f32 %v175_v50, %v174_v49 }
 0x11a   :  { %v177_v52 = vrot.slane %v176_v51, 2 }
 0x11c   :  { %v178_v53 = vadd.f32 %v177_v52, %v176_v51 }
 0x11e   :  { %v179_v0 = vrot.slane %v178_v53, 1 }
 0x120   :  { %v180_v54 = vadd.f32 %v179_v0, %v178_v53 }
 0x122   :  { %200 = vpush %v180_v54 }
 0x153   :  { %s201_s9 = spop %200 }
 0x154   :  { %v182_v55 = vstv %s201_s9 }
 0x155   :  { %183 = vst [vmem:[#allocation7] sm:$0xff] %v182_v55 }
 0x156   :  { %288 = shalt.err (!%p285_p6)
}
 0x157   :  { %s289_s13 = scalar_lea.hbm %s380_s2, 128 }
 0x158   :  { %p290_p7 = scmp.ne.s32.totalorder %s380_s2, %s289_s13  ;;  %p293_p8 = scmp.lt.u32.totalorder %s289_s13, %s380_s2 }
 0x15a   :  { %p295_p9 = pnand %p293_p8, %p290_p7 }
 0x15c   :  { %298 = shalt.err (!%p295_p9)
}
 0x15d   :  { %193 = dma.vmem_to_hbm [thread:$0]  %s191_s8, 128, %s380_s2, [#allocation4]  }
 0x15e   :  { %303 = dma.done.wait [#allocation4], 128  }
 0x15f   :  { %304 = vsyncadd [#allocation4], 4294967168 }
 0x160   :  { %197 = vsyncpa [#allocation3], 1 }
 0x161   :  { %198 = vsyncpa [#allocation6], 1 }
 0x162   :  { %199 = vsyncpa [#allocation4], 1 }

</bundles_post_ra>
